<compile_context>
chip_gen: v5e
topology: v5e:2x2
jax: 0.10.0
libtpu: 0.0.40
codegen_flags: <defaults>
</compile_context>

<pallas_src>
import functools
import math

import jax
import jax.numpy as jnp
from jax import lax
from jax.experimental import pallas as pl
from jax.experimental.pallas import tpu as pltpu


# ---------------------------------------------------------------------------
# Per-chip VMEM sizing
# ---------------------------------------------------------------------------

def _vmem_capacity_bytes():
    try:
        info = pltpu.get_tpu_info()
        cap = getattr(info, "vmem_capacity_bytes", None)
        if cap:
            return int(cap)
    except Exception:
        pass
    return 64 * 1024 * 1024  # conservative (v7x per-TC size)


def _vmem_limit_bytes():
    # Leave ~40% headroom for compiler-internal scratch and pipeline buffers.
    return int(_vmem_capacity_bytes() * 0.6)


def _default_tiles():
    big = _vmem_capacity_bytes() >= 100 * 1024 * 1024   # v5e / v6e (128 MiB)
    return (256, 512) if big else (128, 256)            # (q_block, ffn_block)


# ---------------------------------------------------------------------------
# Pallas kernels
# ---------------------------------------------------------------------------

def _attn_block_kernel(*args, nhead, compute_dtype, has_q_pos, has_k_pos,
                       shared_kv, approx_recip):
    """Fused (pos-add -> MHA -> +residual -> LayerNorm) for one (batch, q-tile).

    Refs (in order, some optional):
      q_src  : (TQ, d)  query source == residual (tgt)
      q_pos  : (TQ, d)  additive positional embedding for the query   [if has_q_pos]
      kv_src : (Lk, d)  key/value source                              [if not shared_kv]
      k_pos  : (Lk, d)  additive positional embedding for the key     [if not shared_kv and has_k_pos]
      wq,bq,wk,bk,wv,bv,wo,bo,g,b : pre-transposed weights (y = x @ W); softmax
                                    scale folded into wq/bq; biases/LN params f32
      o_ref  : (TQ, d)  output
      kp_ref, vp_ref : (Lk, d) VMEM scratch, compute_dtype — projected K/V,
                       computed once per batch (program_id(1)==0) and carried
                       across q-tiles.
    """
    it = iter(args)
    q_src_ref = next(it)
    q_pos_ref = next(it) if has_q_pos else None
    if shared_kv:
        kv_src_ref, k_pos_ref = q_src_ref, q_pos_ref
    else:
        kv_src_ref = next(it)
        k_pos_ref = next(it) if has_k_pos else None
    wq_ref, bq_ref, wk_ref, bk_ref, wv_ref, bv_ref, wo_ref, bo_ref, g_ref, b_ref = (
        next(it), next(it), next(it), next(it), next(it),
        next(it), next(it), next(it), next(it), next(it))
    o_ref = next(it)
    kp_ref = next(it)
    vp_ref = next(it)

    f32 = jnp.float32
    d = q_src_ref.shape[-1]
    hd = d // nhead
    qi = pl.program_id(1)

    # ---- K/V projection: once per batch, persisted across q-tiles ('arbitrary' axis)
    @pl.when(qi == 0)
    def _():
        kv = kv_src_ref[...].astype(compute_dtype)                  # (Lk, d)
        if k_pos_ref is not None:
            xk = (kv.astype(f32) + k_pos_ref[...].astype(f32)).astype(compute_dtype)
        else:
            xk = kv
        kp_ref[...] = (jnp.dot(xk, wk_ref[...], preferred_element_type=f32)
                       + bk_ref[...]).astype(compute_dtype)         # (Lk, d)
        vp_ref[...] = (jnp.dot(kv, wv_ref[...], preferred_element_type=f32)
                       + bv_ref[...]).astype(compute_dtype)         # (Lk, d)

    # ---- Query projection (wide MXU matmul, f32 accumulation) ----
    residual = q_src_ref[...].astype(f32)                           # (TQ, d)
    if q_pos_ref is not None:
        xq = (residual + q_pos_ref[...].astype(f32)).astype(compute_dtype)
    else:
        xq = q_src_ref[...].astype(compute_dtype)
    qp = (jnp.dot(xq, wq_ref[...], preferred_element_type=f32)
          + bq_ref[...]).astype(compute_dtype)                      # (TQ, d), pre-scaled

    kp = kp_ref[...]                                                # (Lk, d) compute dtype
    vp = vp_ref[...]

    # ---- Per-head attention, out-projection accumulated in an f32 register value.
    # No scratch writes / no lane-sliced stores; Wo is sliced on its sublane dim.
    attn = jnp.zeros_like(residual)                                 # (TQ, d) f32
    for h in range(nhead):                    # nhead static -> unrolled at trace
        sl = slice(h * hd, (h + 1) * hd)
        s = lax.dot_general(qp[:, sl], kp[:, sl],
                            dimension_numbers=(((1,), (1,)), ((), ())),
                            preferred_element_type=f32)             # (TQ, Lk) f32
        s = s - jnp.max(s, axis=-1, keepdims=True)
        p = jnp.exp(s)
        denom = jnp.sum(p, axis=-1, keepdims=True)
        if approx_recip:
            p = p * pl.reciprocal(denom, approx=True)
        else:
            p = p / denom
        ctx = jnp.dot(p.astype(compute_dtype), vp[:, sl],
                      preferred_element_type=f32)                   # (TQ, hd)
        attn = attn + jnp.dot(ctx.astype(compute_dtype),
                              wo_ref[h * hd:(h + 1) * hd, :],
                              preferred_element_type=f32)           # (TQ, d)
    attn = attn + bo_ref[...]

    # ---- residual + LayerNorm epilogue on the resident tile ----
    z = residual + attn
    mu = jnp.mean(z, axis=-1, keepdims=True)
    var = jnp.mean(jnp.square(z - mu), axis=-1, keepdims=True)
    zn = (z - mu) * lax.rsqrt(var + 1e-5)
    o_ref[...] = (zn * g_ref[...] + b_ref[...]).astype(o_ref.dtype)


def _ffn_block_kernel(x_ref, w1_ref, b1_ref, w2_ref, b2_ref, g_ref, b_ref,
                      o_ref, *, compute_dtype):
    """Fused (linear1 -> relu -> linear2 -> +residual -> LayerNorm) for one tile."""
    f32 = jnp.float32
    x = x_ref[...].astype(compute_dtype)                            # (TL, d)
    h = jnp.dot(x, w1_ref[...], preferred_element_type=f32) + b1_ref[...]
    h = jnp.maximum(h, 0.0)                                         # (TL, dff) f32
    y = jnp.dot(h.astype(compute_dtype), w2_ref[...],
                preferred_element_type=f32) + b2_ref[...]           # (TL, d) f32
    z = x_ref[...].astype(f32) + y
    mu = jnp.mean(z, axis=-1, keepdims=True)
    var = jnp.mean(jnp.square(z - mu), axis=-1, keepdims=True)
    zn = (z - mu) * lax.rsqrt(var + 1e-5)
    o_ref[...] = (zn * g_ref[...] + b_ref[...]).astype(o_ref.dtype)


# ---------------------------------------------------------------------------
# pallas_call wrappers (batch-first (N, L, E) layout inside)
# ---------------------------------------------------------------------------

def _attn_block(q_src, q_pos, kv_src, k_pos, w, gamma, beta, *,
                nhead, compute_dtype, q_block, share_kv=False):
    """q_src/q_pos: (N, Lq, d); kv_src/k_pos: (N, Lk, d) -> LN(q_src + MHA(...)).

    If share_kv and the whole query fits one tile, kv_src/k_pos are taken to be
    q_src/q_pos inside the kernel (self-attention) and are not streamed twice.
    """
    N, Lq, d = q_src.shape
    tq = min(q_block, Lq)
    shared = bool(share_kv) and (tq >= Lq)
    kv_len = Lq if shared else kv_src.shape[1]
    grid = (N, pl.cdiv(Lq, tq))

    q_map = lambda b, qi: (b, qi, 0)
    kv_map = lambda b, qi: (b, 0, 0)
    w_map = lambda b, qi: (0, 0)

    has_q_pos = q_pos is not None
    has_k_pos = (k_pos is not None) and (not shared)

    inputs = [q_src]
    in_specs = [pl.BlockSpec((None, tq, d), q_map)]
    if has_q_pos:
        inputs.append(q_pos)
        in_specs.append(pl.BlockSpec((None, tq, d), q_map))
    if not shared:
        inputs.append(kv_src)
        in_specs.append(pl.BlockSpec((None, kv_len, d), kv_map))
        if has_k_pos:
            inputs.append(k_pos)
            in_specs.append(pl.BlockSpec((None, kv_len, d), kv_map))
    inputs += [w["wq"], w["bq"], w["wk"], w["bk"], w["wv"], w["bv"],
               w["wo"], w["bo"], gamma, beta]
    in_specs += [
        pl.BlockSpec((d, d), w_map), pl.BlockSpec((1, d), w_map),
        pl.BlockSpec((d, d), w_map), pl.BlockSpec((1, d), w_map),
        pl.BlockSpec((d, d), w_map), pl.BlockSpec((1, d), w_map),
        pl.BlockSpec((d, d), w_map), pl.BlockSpec((1, d), w_map),
        pl.BlockSpec((1, d), w_map), pl.BlockSpec((1, d), w_map),
    ]

    kernel = functools.partial(
        _attn_block_kernel, nhead=nhead, compute_dtype=compute_dtype,
        has_q_pos=has_q_pos, has_k_pos=has_k_pos, shared_kv=shared,
        approx_recip=(compute_dtype != jnp.float32))

    return pl.pallas_call(
        kernel,
        out_shape=jax.ShapeDtypeStruct((N, Lq, d), q_src.dtype),
        grid=grid,
        in_specs=in_specs,
        out_specs=pl.BlockSpec((None, tq, d), q_map),
        scratch_shapes=[pltpu.VMEM((kv_len, d), compute_dtype),   # projected K
                        pltpu.VMEM((kv_len, d), compute_dtype)],  # projected V
        compiler_params=pltpu.CompilerParams(
            # qi axis is 'arbitrary': the K/V scratch carries across q-tiles.
            # TODO(synk): for v7x (2 TCs) with tiny N and a single q-tile the
            #             parallel grid may underfeed megacore; split heads/batch.
            dimension_semantics=("parallel", "arbitrary"),
            vmem_limit_bytes=_vmem_limit_bytes()),
    )(*inputs)


def _ffn_block(x, w1, b1, w2, b2, gamma, beta, *, compute_dtype, l_block):
    """x: (N, L, d) -> LN(x + MLP(x)) with ReLU and pre-transposed weights."""
    N, L, d = x.shape
    dff = w1.shape[1]
    tl = min(l_block, L)
    grid = (N, pl.cdiv(L, tl))

    x_map = lambda b, i: (b, i, 0)
    w_map = lambda b, i: (0, 0)

    kernel = functools.partial(_ffn_block_kernel, compute_dtype=compute_dtype)
    return pl.pallas_call(
        kernel,
        out_shape=jax.ShapeDtypeStruct((N, L, d), x.dtype),
        grid=grid,
        in_specs=[
            pl.BlockSpec((None, tl, d), x_map),
            pl.BlockSpec((d, dff), w_map), pl.BlockSpec((1, dff), w_map),
            pl.BlockSpec((dff, d), w_map), pl.BlockSpec((1, d), w_map),
            pl.BlockSpec((1, d), w_map), pl.BlockSpec((1, d), w_map),
        ],
        out_specs=pl.BlockSpec((None, tl, d), x_map),
        compiler_params=pltpu.CompilerParams(
            dimension_semantics=("parallel", "parallel"),
            vmem_limit_bytes=_vmem_limit_bytes()),
    )(x, w1, b1, w2, b2, gamma, beta)


# ---------------------------------------------------------------------------
# Parameter preparation (host side): transpose weights, fold softmax scale, cast
# ---------------------------------------------------------------------------

def _prepare_params(params, compute_dtype):
    d = params["self_attn"]["wq"].shape[0]
    nhead = params["nhead"]
    assert d % nhead == 0
    scale = 1.0 / math.sqrt(d // nhead)
    f32 = jnp.float32

    def prep_attn(a):
        return {
            "wq": (a["wq"].T * scale).astype(compute_dtype),
            "bq": (a["bq"] * scale).astype(f32),
            "wk": a["wk"].T.astype(compute_dtype),
            "bk": a["bk"].astype(f32),
            "wv": a["wv"].T.astype(compute_dtype),
            "bv": a["bv"].astype(f32),
            "wo": a["wo"].T.astype(compute_dtype),
            "bo": a["bo"].astype(f32),
        }

    return {
        "self_attn": prep_attn(params["self_attn"]),
        "cross_attn": prep_attn(params["cross_attn"]),
        "w1": params["w1"].T.astype(compute_dtype),   # (d, dff)
        "b1": params["b1"].astype(f32),
        "w2": params["w2"].T.astype(compute_dtype),   # (dff, d)
        "b2": params["b2"].astype(f32),
        "norm1_g": params["norm1_g"].astype(f32), "norm1_b": params["norm1_b"].astype(f32),
        "norm2_g": params["norm2_g"].astype(f32), "norm2_b": params["norm2_b"].astype(f32),
        "norm3_g": params["norm3_g"].astype(f32), "norm3_b": params["norm3_b"].astype(f32),
    }


# ---------------------------------------------------------------------------
# Full layer (forward_post path, normalize_before=False)
# ---------------------------------------------------------------------------

def transformer_decoder_layer(params, tgt, memory, pos=None, query_pos=None, *,
                              compute_dtype=jnp.bfloat16, q_block=None, ffn_block=None):
    """tgt: (Lq, N, d), memory: (Lk, N, d) — PyTorch seq-first layout."""
    nhead = params["nhead"]
    prep = _prepare_params(params, compute_dtype)

    dq, dff = _default_tiles()
    q_block = dq if q_block is None else q_block
    ffn_block = dff if ffn_block is None else ffn_block

    out_dtype = tgt.dtype

    # Cast streamed activations to compute dtype (halves HBM DMA + transpose bytes),
    # then seq-first -> batch-first for the kernels.
    # TODO(synk): block directly on the native (L, N, E) layout to drop these transposes.
    tgt_b = jnp.transpose(tgt.astype(compute_dtype), (1, 0, 2))
    mem_b = jnp.transpose(memory.astype(compute_dtype), (1, 0, 2))
    qpos_b = (None if query_pos is None
              else jnp.transpose(query_pos.astype(compute_dtype), (1, 0, 2)))
    pos_b = (None if pos is None
             else jnp.transpose(pos.astype(compute_dtype), (1, 0, 2)))

    # --- self-attention block (q = k = tgt + query_pos, v = tgt; shared stream) ---
    t = _attn_block(tgt_b, qpos_b, tgt_b, qpos_b,
                    prep["self_attn"], prep["norm1_g"], prep["norm1_b"],
                    nhead=nhead, compute_dtype=compute_dtype, q_block=q_block,
                    share_kv=True)

    # --- cross-attention block (q = tgt + query_pos, k = memory + pos, v = memory) ---
    t = _attn_block(t, qpos_b, mem_b, pos_b,
                    prep["cross_attn"], prep["norm2_g"], prep["norm2_b"],
                    nhead=nhead, compute_dtype=compute_dtype, q_block=q_block,
                    share_kv=False)

    # --- feed-forward block ---
    t = _ffn_block(t, prep["w1"], prep["b1"], prep["w2"], prep["b2"],
                   prep["norm3_g"], prep["norm3_b"],
                   compute_dtype=compute_dtype, l_block=ffn_block)

    # batch-first -> seq-first
    return jnp.transpose(t, (1, 0, 2)).astype(out_dtype)


# ---------------------------------------------------------------------------
# Pure-JAX reference (mirrors torch semantics) for a correctness check
# ---------------------------------------------------------------------------

def _ref_mha(q, k, v, p, nhead):
    d = q.shape[-1]
    hd = d // nhead
    qp = q @ p["wq"].T + p["bq"][0]
    kp = k @ p["wk"].T + p["bk"][0]
    vp = v @ p["wv"].T + p["bv"][0]
    qp = qp / math.sqrt(hd)
    N, Lq, _ = q.shape
    Lk = k.shape[1]
    qh = qp.reshape(N, Lq, nhead, hd).transpose(0, 2, 1, 3)
    kh = kp.reshape(N, Lk, nhead, hd).transpose(0, 2, 1, 3)
    vh = vp.reshape(N, Lk, nhead, hd).transpose(0, 2, 1, 3)
    s = jnp.einsum("nhqd,nhkd->nhqk", qh, kh)
    a = jax.nn.softmax(s, axis=-1)
    ctx = jnp.einsum("nhqk,nhkd->nhqd", a, vh).transpose(0, 2, 1, 3).reshape(N, Lq, d)
    return ctx @ p["wo"].T + p["bo"][0]


def _ref_ln(z, g, b):
    mu = jnp.mean(z, axis=-1, keepdims=True)
    var = jnp.mean((z - mu) ** 2, axis=-1, keepdims=True)
    return (z - mu) / jnp.sqrt(var + 1e-5) * g[0] + b[0]


def _reference(params, tgt, memory, pos, query_pos):
    nhead = params["nhead"]
    t = jnp.transpose(tgt, (1, 0, 2))
    m = jnp.transpose(memory, (1, 0, 2))
    qp = jnp.transpose(query_pos, (1, 0, 2))
    pp = jnp.transpose(pos, (1, 0, 2))
    t2 = _ref_mha(t + qp, t + qp, t, params["self_attn"], nhead)
    t = _ref_ln(t + t2, params["norm1_g"], params["norm1_b"])
    t2 = _ref_mha(t + qp, m + pp, m, params["cross_attn"], nhead)
    t = _ref_ln(t + t2, params["norm2_g"], params["norm2_b"])
    h = jnp.maximum(t @ params["w1"].T + params["b1"][0], 0.0)
    t2 = h @ params["w2"].T + params["b2"][0]
    t = _ref_ln(t + t2, params["norm3_g"], params["norm3_b"])
    return jnp.transpose(t, (1, 0, 2))


# ---------------------------------------------------------------------------
# Parameter init (PyTorch weight layout: y = x @ W.T + b)
# ---------------------------------------------------------------------------

def init_params(key, d_model, nhead, dim_feedforward):
    ks = jax.random.split(key, 6)

    def attn_params(k0):
        kk = jax.random.split(k0, 8)
        return {
            "wq": jax.random.normal(kk[0], (d_model, d_model), jnp.float32) * 0.05,
            "wk": jax.random.normal(kk[1], (d_model, d_model), jnp.float32) * 0.05,
            "wv": jax.random.normal(kk[2], (d_model, d_model), jnp.float32) * 0.05,
            "bq": jax.random.normal(kk[3], (1, d_model), jnp.float32) * 0.01,
            "bk": jax.random.normal(kk[4], (1, d_model), jnp.float32) * 0.01,
            "bv": jax.random.normal(kk[5], (1, d_model), jnp.float32) * 0.01,
            "wo": jax.random.normal(kk[6], (d_model, d_model), jnp.float32) * 0.05,
            "bo": jax.random.normal(kk[7], (1, d_model), jnp.float32) * 0.01,
        }

    return {
        "nhead": nhead,
        "self_attn": attn_params(ks[0]),
        "cross_attn": attn_params(ks[1]),
        "w1": jax.random.normal(ks[2], (dim_feedforward, d_model), jnp.float32) * 0.05,
        "b1": jax.random.normal(ks[3], (1, dim_feedforward), jnp.float32) * 0.01,
        "w2": jax.random.normal(ks[4], (d_model, dim_feedforward), jnp.float32) * 0.05,
        "b2": jax.random.normal(ks[5], (1, d_model), jnp.float32) * 0.01,
        "norm1_g": jnp.ones((1, d_model), jnp.float32),
        "norm1_b": jnp.zeros((1, d_model), jnp.float32),
        "norm2_g": jnp.ones((1, d_model), jnp.float32),
        "norm2_b": jnp.zeros((1, d_model), jnp.float32),
        "norm3_g": jnp.ones((1, d_model), jnp.float32),
        "norm3_b": jnp.zeros((1, d_model), jnp.float32),
    }


# ---------------------------------------------------------------------------
# Main
# ---------------------------------------------------------------------------

if __name__ == "__main__":
    d_model = 32
    nhead = 4
    dim_feedforward = 64
    Lq = 8        # tgt sequence length
    Lk = 8        # memory sequence length
    N = 2         # batch

    key = jax.random.PRNGKey(0)
    kp, k1, k2, k3, k4 = jax.random.split(key, 5)
    params = init_params(kp, d_model, nhead, dim_feedforward)

    tgt = jax.random.normal(k1, (Lq, N, d_model), jnp.float32)
    memory = jax.random.normal(k2, (Lk, N, d_model), jnp.float32)
    query_pos = jax.random.normal(k3, (Lq, N, d_model), jnp.float32)
    pos = jax.random.normal(k4, (Lk, N, d_model), jnp.float32)

    ref = _reference(params, tgt, memory, pos, query_pos)

    # f32 compute path (exact softmax reciprocal): tight correctness check.
    out_f32 = transformer_decoder_layer(params, tgt, memory, pos=pos,
                                        query_pos=query_pos,
                                        compute_dtype=jnp.float32)
    out_f32 = jax.block_until_ready(out_f32)
    assert out_f32.shape == (Lq, N, d_model)
    err32 = float(jnp.max(jnp.abs(out_f32 - ref)))
    assert err32 < 1e-3, f"f32 path mismatch vs JAX reference: {err32}"

    # bf16 compute path (default, MXU-friendly, approx softmax reciprocal): looser tol.
    out_bf16 = transformer_decoder_layer(params, tgt, memory, pos=pos,
                                         query_pos=query_pos,
                                         compute_dtype=jnp.bfloat16)
    out_bf16 = jax.block_until_ready(out_bf16)
    assert out_bf16.shape == (Lq, N, d_model)
    err16 = float(jnp.max(jnp.abs(out_bf16.astype(jnp.float32) - ref)))
    assert err16 < 2e-1, f"bf16 path mismatch vs JAX reference: {err16}"

    print("KERNEL_OK")
</pallas_src>

<mosaic_0001>
module attributes {stable_mosaic.version = 11 : i64} {
  func.func @_attn_block_kernel(%arg0: i32, %arg1: i32, %arg2: memref<1x8x32xf32, #tpu.memory_space<vmem>>, %arg3: memref<1x8x32xf32, #tpu.memory_space<vmem>>, %arg4: memref<32x32xf32, #tpu.memory_space<vmem>>, %arg5: memref<1x32xf32, #tpu.memory_space<vmem>>, %arg6: memref<32x32xf32, #tpu.memory_space<vmem>>, %arg7: memref<1x32xf32, #tpu.memory_space<vmem>>, %arg8: memref<32x32xf32, #tpu.memory_space<vmem>>, %arg9: memref<1x32xf32, #tpu.memory_space<vmem>>, %arg10: memref<32x32xf32, #tpu.memory_space<vmem>>, %arg11: memref<1x32xf32, #tpu.memory_space<vmem>>, %arg12: memref<1x32xf32, #tpu.memory_space<vmem>>, %arg13: memref<1x32xf32, #tpu.memory_space<vmem>>, %arg14: memref<1x8x32xf32, #tpu.memory_space<vmem>>, %arg15: memref<8x32xf32, #tpu.memory_space<vmem>>, %arg16: memref<8x32xf32, #tpu.memory_space<vmem>>) attributes {dimension_semantics = [#tpu.dimension_semantics<parallel>, #tpu.dimension_semantics<arbitrary>], iteration_bounds = array<i64: 2, 1>, scalar_prefetch = 0 : i64, scratch_operands = 2 : i64, tpu.core_type = #tpu.core_type<tc>, window_params = [{transform_indices = @transform_0, window_bounds = array<i64: 1, 8, 32>}, {transform_indices = @transform_1, window_bounds = array<i64: 1, 8, 32>}, {pipeline_mode = #tpu.pipeline_mode<synchronous>, transform_indices = @transform_2, window_bounds = array<i64: 32, 32>}, {pipeline_mode = #tpu.pipeline_mode<synchronous>, transform_indices = @transform_3, window_bounds = array<i64: 1, 32>}, {pipeline_mode = #tpu.pipeline_mode<synchronous>, transform_indices = @transform_4, window_bounds = array<i64: 32, 32>}, {pipeline_mode = #tpu.pipeline_mode<synchronous>, transform_indices = @transform_5, window_bounds = array<i64: 1, 32>}, {pipeline_mode = #tpu.pipeline_mode<synchronous>, transform_indices = @transform_6, window_bounds = array<i64: 32, 32>}, {pipeline_mode = #tpu.pipeline_mode<synchronous>, transform_indices = @transform_7, window_bounds = array<i64: 1, 32>}, {pipeline_mode = #tpu.pipeline_mode<synchronous>, transform_indices = @transform_8, window_bounds = array<i64: 32, 32>}, {pipeline_mode = #tpu.pipeline_mode<synchronous>, transform_indices = @transform_9, window_bounds = array<i64: 1, 32>}, {pipeline_mode = #tpu.pipeline_mode<synchronous>, transform_indices = @transform_10, window_bounds = array<i64: 1, 32>}, {pipeline_mode = #tpu.pipeline_mode<synchronous>, transform_indices = @transform_11, window_bounds = array<i64: 1, 32>}, {transform_indices = @transform_12, window_bounds = array<i64: 1, 8, 32>}]} {
    %c0_i32 = arith.constant 0 : i32
    %0 = arith.cmpi eq, %arg1, %c0_i32 : i32
    %1 = arith.extui %0 : i1 to i32
    %c0_i32_0 = arith.constant 0 : i32
    %2 = arith.cmpi ne, %1, %c0_i32_0 : i32
    scf.if %2 {
      %c0_54 = arith.constant 0 : index
      %c0_55 = arith.constant 0 : index
      %c0_56 = arith.constant 0 : index
      %115 = vector.load %arg2[%c0_54, %c0_55, %c0_56] : memref<1x8x32xf32, #tpu.memory_space<vmem>>, vector<1x8x32xf32>
      %116 = vector.shape_cast %115 : vector<1x8x32xf32> to vector<8x32xf32>
      %c0_57 = arith.constant 0 : index
      %c0_58 = arith.constant 0 : index
      %c0_59 = arith.constant 0 : index
      %117 = vector.load %arg3[%c0_57, %c0_58, %c0_59] : memref<1x8x32xf32, #tpu.memory_space<vmem>>, vector<1x8x32xf32>
      %118 = vector.shape_cast %117 : vector<1x8x32xf32> to vector<8x32xf32>
      %119 = arith.addf %116, %118 : vector<8x32xf32>
      %c0_60 = arith.constant 0 : index
      %c0_61 = arith.constant 0 : index
      %120 = vector.load %arg6[%c0_60, %c0_61] : memref<32x32xf32, #tpu.memory_space<vmem>>, vector<32x32xf32>
      %cst_62 = arith.constant dense<0.000000e+00> : vector<8x32xf32>
      %121 = tpu.matmul %119, %120, %cst_62 {dimension_numbers = #tpu.dot_dimension_numbers<[1], [0], [0], [1], [0, 0, 1, 1], [], []>} : vector<8x32xf32>, vector<32x32xf32>, vector<8x32xf32> -> vector<8x32xf32>
      %c0_63 = arith.constant 0 : index
      %c0_64 = arith.constant 0 : index
      %122 = vector.load %arg7[%c0_63, %c0_64] : memref<1x32xf32, #tpu.memory_space<vmem>>, vector<1x32xf32>
      %123 = vector.broadcast %122 : vector<1x32xf32> to vector<8x32xf32>
      %124 = arith.addf %121, %123 : vector<8x32xf32>
      %c0_65 = arith.constant 0 : index
      %c0_66 = arith.constant 0 : index
      %125 = vector.load %arg15[%c0_65, %c0_66] : memref<8x32xf32, #tpu.memory_space<vmem>>, vector<8x32xf32>
      tpu.vector_store %arg15[%c0_65, %c0_66], %124 {strides = array<i32>} : memref<8x32xf32, #tpu.memory_space<vmem>>, vector<8x32xf32>,
      %c0_67 = arith.constant 0 : index
      %c0_68 = arith.constant 0 : index
      %126 = vector.load %arg8[%c0_67, %c0_68] : memref<32x32xf32, #tpu.memory_space<vmem>>, vector<32x32xf32>
      %cst_69 = arith.constant dense<0.000000e+00> : vector<8x32xf32>
      %127 = tpu.matmul %116, %126, %cst_69 {dimension_numbers = #tpu.dot_dimension_numbers<[1], [0], [0], [1], [0, 0, 1, 1], [], []>} : vector<8x32xf32>, vector<32x32xf32>, vector<8x32xf32> -> vector<8x32xf32>
      %c0_70 = arith.constant 0 : index
      %c0_71 = arith.constant 0 : index
      %128 = vector.load %arg9[%c0_70, %c0_71] : memref<1x32xf32, #tpu.memory_space<vmem>>, vector<1x32xf32>
      %129 = vector.broadcast %128 : vector<1x32xf32> to vector<8x32xf32>
      %130 = arith.addf %127, %129 : vector<8x32xf32>
      %c0_72 = arith.constant 0 : index
      %c0_73 = arith.constant 0 : index
      %131 = vector.load %arg16[%c0_72, %c0_73] : memref<8x32xf32, #tpu.memory_space<vmem>>, vector<8x32xf32>
      tpu.vector_store %arg16[%c0_72, %c0_73], %130 {strides = array<i32>} : memref<8x32xf32, #tpu.memory_space<vmem>>, vector<8x32xf32>,
    } else {
    }
    %c0 = arith.constant 0 : index
    %c0_1 = arith.constant 0 : index
    %c0_2 = arith.constant 0 : index
    %3 = vector.load %arg2[%c0, %c0_1, %c0_2] : memref<1x8x32xf32, #tpu.memory_space<vmem>>, vector<1x8x32xf32>
    %4 = vector.shape_cast %3 : vector<1x8x32xf32> to vector<8x32xf32>
    %c0_3 = arith.constant 0 : index
    %c0_4 = arith.constant 0 : index
    %c0_5 = arith.constant 0 : index
    %5 = vector.load %arg3[%c0_3, %c0_4, %c0_5] : memref<1x8x32xf32, #tpu.memory_space<vmem>>, vector<1x8x32xf32>
    %6 = vector.shape_cast %5 : vector<1x8x32xf32> to vector<8x32xf32>
    %7 = arith.addf %4, %6 : vector<8x32xf32>
    %c0_6 = arith.constant 0 : index
    %c0_7 = arith.constant 0 : index
    %8 = vector.load %arg4[%c0_6, %c0_7] : memref<32x32xf32, #tpu.memory_space<vmem>>, vector<32x32xf32>
    %cst = arith.constant dense<0.000000e+00> : vector<8x32xf32>
    %9 = tpu.matmul %7, %8, %cst {dimension_numbers = #tpu.dot_dimension_numbers<[1], [0], [0], [1], [0, 0, 1, 1], [], []>} : vector<8x32xf32>, vector<32x32xf32>, vector<8x32xf32> -> vector<8x32xf32>
    %c0_8 = arith.constant 0 : index
    %c0_9 = arith.constant 0 : index
    %10 = vector.load %arg5[%c0_8, %c0_9] : memref<1x32xf32, #tpu.memory_space<vmem>>, vector<1x32xf32>
    %11 = vector.broadcast %10 : vector<1x32xf32> to vector<8x32xf32>
    %12 = arith.addf %9, %11 : vector<8x32xf32>
    %c0_10 = arith.constant 0 : index
    %c0_11 = arith.constant 0 : index
    %13 = vector.load %arg15[%c0_10, %c0_11] : memref<8x32xf32, #tpu.memory_space<vmem>>, vector<8x32xf32>
    %c0_12 = arith.constant 0 : index
    %c0_13 = arith.constant 0 : index
    %14 = vector.load %arg16[%c0_12, %c0_13] : memref<8x32xf32, #tpu.memory_space<vmem>>, vector<8x32xf32>
    %cst_14 = arith.constant 0.000000e+00 : f32
    %15 = vector.broadcast %cst_14 : f32 to vector<8x32xf32>
    %16 = vector.extract_strided_slice %12 {offsets = [0, 0], sizes = [8, 8], strides = [1, 1]} : vector<8x32xf32> to vector<8x8xf32>
    %17 = vector.extract_strided_slice %13 {offsets = [0, 0], sizes = [8, 8], strides = [1, 1]} : vector<8x32xf32> to vector<8x8xf32>
    %cst_15 = arith.constant dense<0.000000e+00> : vector<8x8xf32>
    %18 = tpu.matmul %16, %17, %cst_15 {dimension_numbers = #tpu.dot_dimension_numbers<[1], [1], [0], [0], [0, 0, 1, 0], [], []>} : vector<8x8xf32>, vector<8x8xf32>, vector<8x8xf32> -> vector<8x8xf32>
    %cst_16 = arith.constant dense<0xFF800000> : vector<8xf32>
    %19 = vector.multi_reduction <maximumf>, %18, %cst_16 [1] : vector<8x8xf32> to vector<8xf32>
    %20 = vector.shape_cast %19 : vector<8xf32> to vector<8x1xf32>
    %21 = vector.broadcast %20 : vector<8x1xf32> to vector<8x8xf32>
    %22 = arith.subf %18, %21 : vector<8x8xf32>
    %23 = math.exp %22 : vector<8x8xf32>
    %cst_17 = arith.constant dense<0.000000e+00> : vector<8xf32>
    %24 = vector.multi_reduction <add>, %23, %cst_17 [1] : vector<8x8xf32> to vector<8xf32>
    %25 = vector.shape_cast %24 : vector<8xf32> to vector<8x1xf32>
    %26 = vector.broadcast %25 : vector<8x1xf32> to vector<8x8xf32>
    %27 = arith.divf %23, %26 : vector<8x8xf32>
    %28 = vector.extract_strided_slice %14 {offsets = [0, 0], sizes = [8, 8], strides = [1, 1]} : vector<8x32xf32> to vector<8x8xf32>
    %cst_18 = arith.constant dense<0.000000e+00> : vector<8x8xf32>
    %29 = tpu.matmul %27, %28, %cst_18 {dimension_numbers = #tpu.dot_dimension_numbers<[1], [0], [0], [1], [0, 0, 1, 1], [], []>} : vector<8x8xf32>, vector<8x8xf32>, vector<8x8xf32> -> vector<8x8xf32>
    %c0_19 = arith.constant 0 : index
    %c0_20 = arith.constant 0 : index
    %30 = vector.load %arg10[%c0_19, %c0_20] : memref<32x32xf32, #tpu.memory_space<vmem>>, vector<8x32xf32>
    %cst_21 = arith.constant dense<0.000000e+00> : vector<8x32xf32>
    %31 = tpu.matmul %29, %30, %cst_21 {dimension_numbers = #tpu.dot_dimension_numbers<[1], [0], [0], [1], [0, 0, 1, 1], [], []>} : vector<8x8xf32>, vector<8x32xf32>, vector<8x32xf32> -> vector<8x32xf32>
    %32 = arith.addf %15, %31 : vector<8x32xf32>
    %33 = vector.extract_strided_slice %12 {offsets = [0, 8], sizes = [8, 8], strides = [1, 1]} : vector<8x32xf32> to vector<8x8xf32>
    %34 = vector.extract_strided_slice %13 {offsets = [0, 8], sizes = [8, 8], strides = [1, 1]} : vector<8x32xf32> to vector<8x8xf32>
    %cst_22 = arith.constant dense<0.000000e+00> : vector<8x8xf32>
    %35 = tpu.matmul %33, %34, %cst_22 {dimension_numbers = #tpu.dot_dimension_numbers<[1], [1], [0], [0], [0, 0, 1, 0], [], []>} : vector<8x8xf32>, vector<8x8xf32>, vector<8x8xf32> -> vector<8x8xf32>
    %cst_23 = arith.constant dense<0xFF800000> : vector<8xf32>
    %36 = vector.multi_reduction <maximumf>, %35, %cst_23 [1] : vector<8x8xf32> to vector<8xf32>
    %37 = vector.shape_cast %36 : vector<8xf32> to vector<8x1xf32>
    %38 = vector.broadcast %37 : vector<8x1xf32> to vector<8x8xf32>
    %39 = arith.subf %35, %38 : vector<8x8xf32>
    %40 = math.exp %39 : vector<8x8xf32>
    %cst_24 = arith.constant dense<0.000000e+00> : vector<8xf32>
    %41 = vector.multi_reduction <add>, %40, %cst_24 [1] : vector<8x8xf32> to vector<8xf32>
    %42 = vector.shape_cast %41 : vector<8xf32> to vector<8x1xf32>
    %43 = vector.broadcast %42 : vector<8x1xf32> to vector<8x8xf32>
    %44 = arith.divf %40, %43 : vector<8x8xf32>
    %45 = vector.extract_strided_slice %14 {offsets = [0, 8], sizes = [8, 8], strides = [1, 1]} : vector<8x32xf32> to vector<8x8xf32>
    %cst_25 = arith.constant dense<0.000000e+00> : vector<8x8xf32>
    %46 = tpu.matmul %44, %45, %cst_25 {dimension_numbers = #tpu.dot_dimension_numbers<[1], [0], [0], [1], [0, 0, 1, 1], [], []>} : vector<8x8xf32>, vector<8x8xf32>, vector<8x8xf32> -> vector<8x8xf32>
    %c8 = arith.constant 8 : index
    %c0_26 = arith.constant 0 : index
    %47 = vector.load %arg10[%c8, %c0_26] : memref<32x32xf32, #tpu.memory_space<vmem>>, vector<8x32xf32>
    %cst_27 = arith.constant dense<0.000000e+00> : vector<8x32xf32>
    %48 = tpu.matmul %46, %47, %cst_27 {dimension_numbers = #tpu.dot_dimension_numbers<[1], [0], [0], [1], [0, 0, 1, 1], [], []>} : vector<8x8xf32>, vector<8x32xf32>, vector<8x32xf32> -> vector<8x32xf32>
    %49 = arith.addf %32, %48 : vector<8x32xf32>
    %50 = vector.extract_strided_slice %12 {offsets = [0, 16], sizes = [8, 8], strides = [1, 1]} : vector<8x32xf32> to vector<8x8xf32>
    %51 = vector.extract_strided_slice %13 {offsets = [0, 16], sizes = [8, 8], strides = [1, 1]} : vector<8x32xf32> to vector<8x8xf32>
    %cst_28 = arith.constant dense<0.000000e+00> : vector<8x8xf32>
    %52 = tpu.matmul %50, %51, %cst_28 {dimension_numbers = #tpu.dot_dimension_numbers<[1], [1], [0], [0], [0, 0, 1, 0], [], []>} : vector<8x8xf32>, vector<8x8xf32>, vector<8x8xf32> -> vector<8x8xf32>
    %cst_29 = arith.constant dense<0xFF800000> : vector<8xf32>
    %53 = vector.multi_reduction <maximumf>, %52, %cst_29 [1] : vector<8x8xf32> to vector<8xf32>
    %54 = vector.shape_cast %53 : vector<8xf32> to vector<8x1xf32>
    %55 = vector.broadcast %54 : vector<8x1xf32> to vector<8x8xf32>
    %56 = arith.subf %52, %55 : vector<8x8xf32>
    %57 = math.exp %56 : vector<8x8xf32>
    %cst_30 = arith.constant dense<0.000000e+00> : vector<8xf32>
    %58 = vector.multi_reduction <add>, %57, %cst_30 [1] : vector<8x8xf32> to vector<8xf32>
    %59 = vector.shape_cast %58 : vector<8xf32> to vector<8x1xf32>
    %60 = vector.broadcast %59 : vector<8x1xf32> to vector<8x8xf32>
    %61 = arith.divf %57, %60 : vector<8x8xf32>
    %62 = vector.extract_strided_slice %14 {offsets = [0, 16], sizes = [8, 8], strides = [1, 1]} : vector<8x32xf32> to vector<8x8xf32>
    %cst_31 = arith.constant dense<0.000000e+00> : vector<8x8xf32>
    %63 = tpu.matmul %61, %62, %cst_31 {dimension_numbers = #tpu.dot_dimension_numbers<[1], [0], [0], [1], [0, 0, 1, 1], [], []>} : vector<8x8xf32>, vector<8x8xf32>, vector<8x8xf32> -> vector<8x8xf32>
    %c16 = arith.constant 16 : index
    %c0_32 = arith.constant 0 : index
    %64 = vector.load %arg10[%c16, %c0_32] : memref<32x32xf32, #tpu.memory_space<vmem>>, vector<8x32xf32>
    %cst_33 = arith.constant dense<0.000000e+00> : vector<8x32xf32>
    %65 = tpu.matmul %63, %64, %cst_33 {dimension_numbers = #tpu.dot_dimension_numbers<[1], [0], [0], [1], [0, 0, 1, 1], [], []>} : vector<8x8xf32>, vector<8x32xf32>, vector<8x32xf32> -> vector<8x32xf32>
    %66 = arith.addf %49, %65 : vector<8x32xf32>
    %67 = vector.extract_strided_slice %12 {offsets = [0, 24], sizes = [8, 8], strides = [1, 1]} : vector<8x32xf32> to vector<8x8xf32>
    %68 = vector.extract_strided_slice %13 {offsets = [0, 24], sizes = [8, 8], strides = [1, 1]} : vector<8x32xf32> to vector<8x8xf32>
    %cst_34 = arith.constant dense<0.000000e+00> : vector<8x8xf32>
    %69 = tpu.matmul %67, %68, %cst_34 {dimension_numbers = #tpu.dot_dimension_numbers<[1], [1], [0], [0], [0, 0, 1, 0], [], []>} : vector<8x8xf32>, vector<8x8xf32>, vector<8x8xf32> -> vector<8x8xf32>
    %cst_35 = arith.constant dense<0xFF800000> : vector<8xf32>
    %70 = vector.multi_reduction <maximumf>, %69, %cst_35 [1] : vector<8x8xf32> to vector<8xf32>
    %71 = vector.shape_cast %70 : vector<8xf32> to vector<8x1xf32>
    %72 = vector.broadcast %71 : vector<8x1xf32> to vector<8x8xf32>
    %73 = arith.subf %69, %72 : vector<8x8xf32>
    %74 = math.exp %73 : vector<8x8xf32>
    %cst_36 = arith.constant dense<0.000000e+00> : vector<8xf32>
    %75 = vector.multi_reduction <add>, %74, %cst_36 [1] : vector<8x8xf32> to vector<8xf32>
    %76 = vector.shape_cast %75 : vector<8xf32> to vector<8x1xf32>
    %77 = vector.broadcast %76 : vector<8x1xf32> to vector<8x8xf32>
    %78 = arith.divf %74, %77 : vector<8x8xf32>
    %79 = vector.extract_strided_slice %14 {offsets = [0, 24], sizes = [8, 8], strides = [1, 1]} : vector<8x32xf32> to vector<8x8xf32>
    %cst_37 = arith.constant dense<0.000000e+00> : vector<8x8xf32>
    %80 = tpu.matmul %78, %79, %cst_37 {dimension_numbers = #tpu.dot_dimension_numbers<[1], [0], [0], [1], [0, 0, 1, 1], [], []>} : vector<8x8xf32>, vector<8x8xf32>, vector<8x8xf32> -> vector<8x8xf32>
    %c24 = arith.constant 24 : index
    %c0_38 = arith.constant 0 : index
    %81 = vector.load %arg10[%c24, %c0_38] : memref<32x32xf32, #tpu.memory_space<vmem>>, vector<8x32xf32>
    %cst_39 = arith.constant dense<0.000000e+00> : vector<8x32xf32>
    %82 = tpu.matmul %80, %81, %cst_39 {dimension_numbers = #tpu.dot_dimension_numbers<[1], [0], [0], [1], [0, 0, 1, 1], [], []>} : vector<8x8xf32>, vector<8x32xf32>, vector<8x32xf32> -> vector<8x32xf32>
    %83 = arith.addf %66, %82 : vector<8x32xf32>
    %c0_40 = arith.constant 0 : index
    %c0_41 = arith.constant 0 : index
    %84 = vector.load %arg11[%c0_40, %c0_41] : memref<1x32xf32, #tpu.memory_space<vmem>>, vector<1x32xf32>
    %85 = vector.broadcast %84 : vector<1x32xf32> to vector<8x32xf32>
    %86 = arith.addf %83, %85 : vector<8x32xf32>
    %87 = arith.addf %4, %86 : vector<8x32xf32>
    %cst_42 = arith.constant dense<0.000000e+00> : vector<8xf32>
    %88 = vector.multi_reduction <add>, %87, %cst_42 [1] : vector<8x32xf32> to vector<8xf32>
    %89 = vector.shape_cast %88 : vector<8xf32> to vector<8x1xf32>
    %cst_43 = arith.constant 3.200000e+01 : f32
    %90 = vector.broadcast %cst_43 : f32 to vector<8x1xf32>
    %91 = arith.divf %89, %90 : vector<8x1xf32>
    %92 = vector.broadcast %91 : vector<8x1xf32> to vector<8x32xf32>
    %93 = arith.subf %87, %92 : vector<8x32xf32>
    %94 = arith.mulf %93, %93 : vector<8x32xf32>
    %cst_44 = arith.constant dense<0.000000e+00> : vector<8xf32>
    %95 = vector.multi_reduction <add>, %94, %cst_44 [1] : vector<8x32xf32> to vector<8xf32>
    %96 = vector.shape_cast %95 : vector<8xf32> to vector<8x1xf32>
    %cst_45 = arith.constant 3.200000e+01 : f32
    %97 = vector.broadcast %cst_45 : f32 to vector<8x1xf32>
    %98 = arith.divf %96, %97 : vector<8x1xf32>
    %99 = vector.broadcast %91 : vector<8x1xf32> to vector<8x32xf32>
    %100 = arith.subf %87, %99 : vector<8x32xf32>
    %cst_46 = arith.constant 9.99999974E-6 : f32
    %101 = vector.broadcast %cst_46 : f32 to vector<8x1xf32>
    %102 = arith.addf %98, %101 : vector<8x1xf32>
    %103 = math.rsqrt %102 : vector<8x1xf32>
    %104 = vector.broadcast %103 : vector<8x1xf32> to vector<8x32xf32>
    %105 = arith.mulf %100, %104 : vector<8x32xf32>
    %c0_47 = arith.constant 0 : index
    %c0_48 = arith.constant 0 : index
    %106 = vector.load %arg12[%c0_47, %c0_48] : memref<1x32xf32, #tpu.memory_space<vmem>>, vector<1x32xf32>
    %107 = vector.broadcast %106 : vector<1x32xf32> to vector<8x32xf32>
    %108 = arith.mulf %105, %107 : vector<8x32xf32>
    %c0_49 = arith.constant 0 : index
    %c0_50 = arith.constant 0 : index
    %109 = vector.load %arg13[%c0_49, %c0_50] : memref<1x32xf32, #tpu.memory_space<vmem>>, vector<1x32xf32>
    %110 = vector.broadcast %109 : vector<1x32xf32> to vector<8x32xf32>
    %111 = arith.addf %108, %110 : vector<8x32xf32>
    %c0_51 = arith.constant 0 : index
    %c0_52 = arith.constant 0 : index
    %c0_53 = arith.constant 0 : index
    %112 = vector.load %arg14[%c0_51, %c0_52, %c0_53] : memref<1x8x32xf32, #tpu.memory_space<vmem>>, vector<1x8x32xf32>
    %113 = vector.shape_cast %112 : vector<1x8x32xf32> to vector<8x32xf32>
    %114 = vector.shape_cast %111 : vector<8x32xf32> to vector<1x8x32xf32>
    tpu.vector_store %arg14[%c0_51, %c0_52, %c0_53], %114 {strides = array<i32>} : memref<1x8x32xf32, #tpu.memory_space<vmem>>, vector<1x8x32xf32>,
    return
  }
  func.func @transform_0(%arg0: i32, %arg1: i32) -> (i32, i32, i32) {
    %c0_i32 = arith.constant 0 : i32
    %c0_i32_0 = arith.constant 0 : i32
    return %arg0, %arg1, %c0_i32 : i32, i32, i32
  }
  func.func @transform_1(%arg0: i32, %arg1: i32) -> (i32, i32, i32) {
    %c0_i32 = arith.constant 0 : i32
    %c0_i32_0 = arith.constant 0 : i32
    return %arg0, %arg1, %c0_i32 : i32, i32, i32
  }
  func.func @transform_2(%arg0: i32, %arg1: i32) -> (i32, i32) {
    %c0_i32 = arith.constant 0 : i32
    %c0_i32_0 = arith.constant 0 : i32
    %c0_i32_1 = arith.constant 0 : i32
    return %c0_i32, %c0_i32_0 : i32, i32
  }
  func.func @transform_3(%arg0: i32, %arg1: i32) -> (i32, i32) {
    %c0_i32 = arith.constant 0 : i32
    %c0_i32_0 = arith.constant 0 : i32
    %c0_i32_1 = arith.constant 0 : i32
    return %c0_i32, %c0_i32_0 : i32, i32
  }
  func.func @transform_4(%arg0: i32, %arg1: i32) -> (i32, i32) {
    %c0_i32 = arith.constant 0 : i32
    %c0_i32_0 = arith.constant 0 : i32
    %c0_i32_1 = arith.constant 0 : i32
    return %c0_i32, %c0_i32_0 : i32, i32
  }
  func.func @transform_5(%arg0: i32, %arg1: i32) -> (i32, i32) {
    %c0_i32 = arith.constant 0 : i32
    %c0_i32_0 = arith.constant 0 : i32
    %c0_i32_1 = arith.constant 0 : i32
    return %c0_i32, %c0_i32_0 : i32, i32
  }
  func.func @transform_6(%arg0: i32, %arg1: i32) -> (i32, i32) {
    %c0_i32 = arith.constant 0 : i32
    %c0_i32_0 = arith.constant 0 : i32
    %c0_i32_1 = arith.constant 0 : i32
    return %c0_i32, %c0_i32_0 : i32, i32
  }
  func.func @transform_7(%arg0: i32, %arg1: i32) -> (i32, i32) {
    %c0_i32 = arith.constant 0 : i32
    %c0_i32_0 = arith.constant 0 : i32
    %c0_i32_1 = arith.constant 0 : i32
    return %c0_i32, %c0_i32_0 : i32, i32
  }
  func.func @transform_8(%arg0: i32, %arg1: i32) -> (i32, i32) {
    %c0_i32 = arith.constant 0 : i32
    %c0_i32_0 = arith.constant 0 : i32
    %c0_i32_1 = arith.constant 0 : i32
    return %c0_i32, %c0_i32_0 : i32, i32
  }
  func.func @transform_9(%arg0: i32, %arg1: i32) -> (i32, i32) {
    %c0_i32 = arith.constant 0 : i32
    %c0_i32_0 = arith.constant 0 : i32
    %c0_i32_1 = arith.constant 0 : i32
    return %c0_i32, %c0_i32_0 : i32, i32
  }
  func.func @transform_10(%arg0: i32, %arg1: i32) -> (i32, i32) {
    %c0_i32 = arith.constant 0 : i32
    %c0_i32_0 = arith.constant 0 : i32
    %c0_i32_1 = arith.constant 0 : i32
    return %c0_i32, %c0_i32_0 : i32, i32
  }
  func.func @transform_11(%arg0: i32, %arg1: i32) -> (i32, i32) {
    %c0_i32 = arith.constant 0 : i32
    %c0_i32_0 = arith.constant 0 : i32
    %c0_i32_1 = arith.constant 0 : i32
    return %c0_i32, %c0_i32_0 : i32, i32
  }
  func.func @transform_12(%arg0: i32, %arg1: i32) -> (i32, i32, i32) {
    %c0_i32 = arith.constant 0 : i32
    %c0_i32_0 = arith.constant 0 : i32
    return %arg0, %arg1, %c0_i32 : i32, i32, i32
  }
}

</mosaic_0001>

<bundles_post_ra>
// kernel: tpu_custom_call.1
= control target key start
LH: loop header
LB: loop body
LE: loop exit
PB: predicated region body
PF: predicated region fallthrough
CT: control target
= control target key end

     0   :  { %s2078_s0 = inlined_call_operand.hbm [shape: f32[2,8,32], index: 0, kind: input, shape index: {}]   ;;  %s2079_s1 = inlined_call_operand.hbm [shape: f32[2,8,32], index: 1, kind: input, shape index: {}]   ;;  %s2080_s2 = inlined_call_operand.hbm [shape: f32[32,32], index: 2, kind: input, shape index: {}]   ;;  %s2081_s3 = inlined_call_operand.vmem [shape: f32[1,32], index: 3, kind: input, shape index: {}]   ;;  %s2082_s4 = inlined_call_operand.hbm [shape: f32[32,32], index: 4, kind: input, shape index: {}]   ;;  %s2083_s5 = inlined_call_operand.vmem [shape: f32[1,32], index: 5, kind: input, shape index: {}]   ;;  %s2084_s6 = inlined_call_operand.hbm [shape: f32[32,32], index: 6, kind: input, shape index: {}]   ;;  %s2085_s7 = inlined_call_operand.vmem [shape: f32[1,32], index: 7, kind: input, shape index: {}]   ;;  %s2086_s8 = inlined_call_operand.hbm [shape: f32[32,32], index: 8, kind: input, shape index: {}]   ;;  %s2087_s9 = inlined_call_operand.vmem [shape: f32[1,32], index: 9, kind: input, shape index: {}]   ;;  %s2088_s10 = inlined_call_operand.vmem [shape: f32[1,32], index: 10, kind: input, shape index: {}]   ;;  %s2089_s11 = inlined_call_operand.vmem [shape: f32[1,32], index: 11, kind: input, shape index: {}]   ;;  %s2090_s12 = inlined_call_operand.hbm [shape: f32[2,8,32], index: 12, kind: output, shape index: {}]  }
   0x1   :  { %2099 = sst [smem:[#allocation29_spill]] %s2080_s2 }
   0x2   :  { %2100 = sst [smem:[#allocation30_spill]] %s2082_s4 }
   0x3   :  { %2101 = sst [smem:[#allocation31_spill]] %s2084_s6 }
   0x4   :  { %2102 = sst [smem:[#allocation32_spill]] %s2086_s8 }
   0x5   :  { %2103 = sst [smem:[#allocation33_spill]] %s2089_s11 }
   0x6   :  { %2104 = sst [smem:[#allocation34_spill]] %s2090_s12 }
   0x7   :  { %17 = vsyncpa [#allocation5], 0 }
   0x8   :  { %19 = vsyncpa [#allocation5 + $0x1], 0 }
   0x9   :  { %20 = vsyncpa [#allocation8], 0 }
   0xa   :  { %22 = vsyncpa [#allocation8 + $0x1], 0 }
   0xb   :  { %23 = vsyncpa [#allocation11], 0 }
   0xc   :  { %24 = vsyncpa [#allocation14], 0 }
   0xd   :  { %25 = vsyncpa [#allocation6], 0 }
   0xe   :  { %27 = vsyncpa [#allocation6 + $0x1], 0  ;;  %s1815_s21 = smov 0   ;;  %s1817_s22 = smov 0  }
   0xf   :  { %s1819_s23 = smov 0   ;;  %s1821_s24 = smov 0  }
  0x10   :  { %s1823_s25 = smov 0   ;;  %s1825_s26 = smov 0  }
  0x11 LB: > { %2105 = sst [smem:[#allocation22_spill]] %s1718_s21  ;;  %s1846_s27 = sadd.s32 4294967295, %s1738_s26   ;;  %s1738_s26 = sphi %s1825_s26, %s33_s26   ;;  %s1734_s25 = sphi %s1823_s25, %s2135_s25   ;;  %s1730_s24 = sphi %s1821_s24, %s2130_s24   ;;  %s1726_s23 = sphi %s1819_s23, %s2134_s23   ;;  %s1722_s22 = sphi %s1817_s22, %s2133_s22   ;;  %s1718_s21 = sphi %s1815_s21, %s2132_s21  }
  0x12   : > { %2106 = sst [smem:[#allocation23_spill]] %s1726_s23  ;;  %p1279_p0 = scmp.ge.s32.totalorder %s1738_s26, 1 }
  0x13   : > { %2107 = sst [smem:[#allocation24_spill]] %s1734_s25  ;;  %p68_p1 = scmp.eq.s32.totalorder %s1846_s27, 0 }
  0x14   : > { %p344_p2 = scmp.lt.s32.totalorder %s1738_s26, 3  ;;  %s2108_s2 = sld [smem:[#allocation29_spill]] }
  0x15   : > { %s1740_s14 = smov [#allocation9]   ;;  %p1284_p6 = scmp.ge.s32.totalorder %s1738_s26, 2 }
  0x16   : > { %p1854_p3 = pnand %p1279_p0, %p344_p2  ;;  %s357_s15 = sshll.u32 %s1740_s14, 4  ;;  %s358_s15 = int_to_ptr.vmem [resolvable:$true] %s357_s15 }
  0x17   : > { %s2111_s4 = sld [smem:[#allocation30_spill]]  ;;  %s1741_s20 = smov 128  }
  0x18   : > { %p1342_p4 = pneg %p1854_p3  ;;  %s1742_s28 = smov 8  }
  0x19   : > { %s1743_s29 = smov [#allocation10]   ;;  %s2112_s6 = sld [smem:[#allocation31_spill]] }
  0x1a   : > { %s355_s30 = sshll.u32 %s2108_s2, 4  ;;  %p1862_p5 = pnand %p1342_p4, %p68_p1  ;;  %s356_s30 = int_to_ptr.hbm [resolvable:$true] %s355_s30 }
  0x1b   : > { %s374_s14 = sshll.u32 %s1743_s29, 4  ;;  %s2113_s8 = sld [smem:[#allocation32_spill]]  ;;  %s375_s14 = int_to_ptr.vmem [resolvable:$true] %s374_s14 }
  0x1c   : > { %1345 = dma.hbm_to_vmem [thread:$0]  (!%p1862_p5), %s356_s30, 512, %s358_s15, [#allocation8], %s1741_s20, %s1741_s20, %s1742_s28  }
  0x1d   : > { %s372_s19 = sshll.u32 %s2111_s4, 4  ;;  %s1744_s15 = smov [#allocation12]   ;;  %s373_s19 = int_to_ptr.hbm [resolvable:$true] %s372_s19 }
  0x1e   : > { %1348 = dma.hbm_to_vmem [thread:$0]  (!%p1862_p5), %s373_s19, 512, %s375_s14, [#allocation11], %s1741_s20, %s1741_s20, %s1742_s28  }
  0x1f   : > { %s389_s12 = sshll.u32 %s2112_s6, 4  ;;  %s391_s4 = sshll.u32 %s1744_s15, 4  ;;  %s390_s12 = int_to_ptr.hbm [resolvable:$true] %s389_s12  ;;  %s392_s4 = int_to_ptr.vmem [resolvable:$true] %s391_s4 }
  0x20   : > { %1351 = dma.hbm_to_vmem [thread:$0]  (!%p1862_p5), %s390_s12, 512, %s392_s4, [#allocation11], %s1741_s20, %s1741_s20, %s1742_s28  }
  0x21   : > { %s406_s30 = sshll.u32 %s2113_s8, 4  ;;  %s1745_s2 = smov [#allocation13]   ;;  %s407_s30 = int_to_ptr.hbm [resolvable:$true] %s406_s30 }
  0x22   : > { %s408_s11 = sshll.u32 %s1745_s2, 4  ;;  %s1278_s19 = sadd.s32 4294967294, %s1738_s26   ;;  %s409_s11 = int_to_ptr.vmem [resolvable:$true] %s408_s11 }
  0x23   : > { %1354 = dma.hbm_to_vmem [thread:$0]  (!%p1862_p5), %s407_s30, 512, %s409_s11, [#allocation14], %s1741_s20, %s1741_s20, %s1742_s28  }
  0x24   : > { %s45_s29 = sadd.s32 1, %s1734_s25  ;;  %s54_s14 = sadd.s32 1, %s1726_s23 }
  0x25   : > { %p47_p7 = scmp.ge.s32.totalorder %s45_s29, 2  ;;  %p61_p8 = scmp.ne.s32.totalorder %s1726_s23, %s1722_s22 }
  0x26   : > { %p62_p9 = scmp.eq.s32.totalorder %s1738_s26, 0  ;;  %p67_p11 = scmp.ne.s32.totalorder %s1722_s22, %s1718_s21 }
  0x27   : > { %s2137_s29 = smov (%p47_p7, %s45_s29), 0  ;;  %p331_p12 = scmp.eq.s32.totalorder %s1846_s27, 1 }
  0x28   : > { %2114 = sst [smem:[#allocation25_spill]] %s2137_s29  ;;  %p1892_p10 = por %p62_p9, %p61_p8 }
  0x29   : > { %s49_s12 = ssub.s32 %s1734_s25, %s2137_s29  ;;  %p1903_p0 = por %p68_p1, %p67_p11 }
  0x2a   : > { %p52_p13 = scmp.eq.s32.totalorder %s49_s12, 0  ;;  %p1907_p2 = por %p331_p12, %p61_p8 }
  0x2b   : > { %p337_p4 = scmp.eq.s32.totalorder %s1278_s19, 1  ;;  %p1370_p7 = scmp.lt.s32.totalorder %s1738_s26, 2 }
  0x2c   : > { %s2117_s20 = scalar_select %p1907_p2, 1, 0 }
  0x2d   : > { %s1912_s28 = scalar_select %p52_p13, %s1726_s23, %s54_s14  }
  0x2e   : > { %2118 = sst [smem:[#allocation26_spill]] %s2117_s20  ;;  %p1914_p5 = por %p337_p4, %p67_p11 }
  0x2f   : > { %2119 = sst [smem:[#allocation27_spill]] %s1912_s28  ;;  %s431_s18 = sand.u32 1, %s1726_s23  }
  0x30   : > { %s2120_s17 = scalar_select %p1914_p5, 1, 0 }
  0x31   : > { %s1286_s30 = sshll.u32 %s1734_s25, 3  ;;  %s1285_s15 = sshll.u32 %s431_s18, 3 }
  0x32   : > { %2121 = sst [smem:[#allocation28_spill]] %s2120_s17  ;;  %s440_s12 = scalar_lea.hbm %s2078_s0, %s1286_s30 }
  0x33   : > { %s442_s6 = sshll.u32 %s440_s12, 4  ;;  %s435_s8 = scalar_lea.vmem [#allocation4], %s1285_s15  ;;  %s443_s6 = int_to_ptr.hbm [resolvable:$true] %s442_s6 }
  0x34   : > { %s444_s29 = sshll.u32 %s435_s8, 4  ;;  %p1356_p8 = pnand %p1370_p7, %p1892_p10  ;;  %s445_s29 = int_to_ptr.vmem [resolvable:$true] %s444_s29 }
  0x35   : > { %s460_s28 = scalar_lea.hbm %s2079_s1, %s1286_s30  ;;  %s451_s17 = sand.u32 1, %s1738_s26  }
  0x36   : > { %s432_s21 = scalar_lea.sflag [#allocation5], %s431_s18  ;;  %s462_s25 = sshll.u32 %s460_s28, 4  ;;  %s463_s25 = int_to_ptr.hbm [resolvable:$true] %s462_s25 }
  0x37   : > { %1358 = dma.hbm_to_vmem [thread:$0]  (!%p1356_p8), %s443_s6, 128, %s445_s29, %s432_s21  }
  0x38   : > { %s455_s23 = scalar_lea.vmem [#allocation7], %s1285_s15  ;;  %s452_s2 = scalar_lea.sflag [#allocation8], %s451_s17 }
  0x39   : > { %s464_s20 = sshll.u32 %s455_s23, 4  ;;  %473 = sbr.rel (%p1854_p3) target bundleno = 1695 (0x69f), region = 68  ;;  %s465_s20 = int_to_ptr.vmem [resolvable:$true] %s464_s20 }
  0x3a   : > { %1361 = dma.hbm_to_vmem [thread:$0]  (!%p1356_p8), %s463_s25, 128, %s465_s20, %s452_s2  }
  0x3b   : > { %s1933_s8 = sand.u32 (!%p1854_p3), 1, %s1722_s22  }
  0x3c   : > { %s1936_s4 = sshll.u32 (!%p1854_p3), %s1933_s8, 3  ;;  %s476_s6 = scalar_lea.sflag (!%p1854_p3), [#allocation5], %s1933_s8 }
  0x3d   : > { %s479_s21 = scalar_lea.vmem (!%p1854_p3), [#allocation4], %s1936_s4 }
  0x3e   : > { %1693 = dma.done.wait (%p1903_p0), %s476_s6, 128  }
  0x3f   : > { %1695 = vsyncadd (%p1903_p0), %s476_s6, 4294967168  ;;  %s485_s23 = sand.u32 1, %s1846_s27   ;;  %s489_s13 = scalar_lea.vmem [#allocation7], %s1936_s4 }
  0x40   : > { %s486_s25 = scalar_lea.sflag [#allocation8], %s485_s23 }
  0x41   : > { %1697 = dma.done.wait (%p1903_p0), %s486_s25, 128  }
  0x42   : > { %1699 = vsyncadd (%p1903_p0), %s486_s25, 4294967168 }
  0x43   : > { %1701 = dma.done.wait (%p68_p1), [#allocation8], 512  }
  0x44   : > { %1703 = vsyncadd (%p68_p1), [#allocation8], 4294966784 }
  0x45   : > { %1705 = dma.done.wait (%p68_p1), [#allocation11], 1024  }
  0x46   : > { %1707 = vsyncadd (%p68_p1), [#allocation11], 4294966272 }
  0x47   : > { %1709 = dma.done.wait (%p68_p1), [#allocation14], 512  }
  0x48   : > { %1711 = vsyncadd (%p68_p1), [#allocation14], 4294966784  ;;  %v566_v0 = vld [vmem:[#allocation10 + $0x18] sm:$0xff]  ;;  %v565_v1 = vld [vmem:[#allocation10 + $0x10] sm:$0xff]  ;;  %vm571_vm0 = vcmask 261120   ;;  %vm665_vm1 = vcmask 64512  }
  0x49   : > { %587 = vmatpush.msra.mxu0 %v566_v0  ;;  %v634_v2 = vld [vmem:[#allocation9 + $0x18] sm:$0xff]  ;;  %v1962_v3 = vld [vmem:[%s479_s21] sm:$0xff]  ;;  %v633_v6 = vld [vmem:[#allocation9 + $0x10] sm:$0xff]  ;;  %s1746_s28 = smov 112   ;;  %s1747_s17 = smov 120  }
  0x4a   : > { %v564_v4 = vld [vmem:[#allocation10 + $0x8] sm:$0xff]  ;;  %655 = vmatpush.msra.mxu2 %v634_v2  ;;  %v561_v5 = vld [vmem:[%s489_s13] sm:$0xff]  ;;  %v563_v7 = vld [vmem:[#allocation10] sm:$0xff]  ;;  %s1748_s18 = smov 104   ;;  %s1317_s19 = sshll.u32 %s1730_s24, 3 }
  0x4b   : > { %588 = vmatpush.msra.mxu0 %v565_v1  ;;  %v632_v8 = vld [vmem:[#allocation9 + $0x8] sm:$0xff]  ;;  %v562_v9 = vadd.f32 %v561_v5, %v1962_v3  ;;  %v631_v10 = vld [vmem:[#allocation9] sm:$0xff]  ;;  %v1434_v11 = vld [vmem:[%s2083_s5] ss:$0 sm:$0xff]  ;;  %s2122_s23 = sld [smem:[#allocation34_spill]]  ;;  %s555_s24 = scalar_lea.vmem [#allocation15], %s1936_s4 }
  0x4c   : > { %656 = vmatpush.msra.mxu2 %v633_v6  ;;  %v1435_v14 = vld [vmem:[%s2081_s3] ss:$0 sm:$0xff]  ;;  %v599_v23 = vld [vmem:[#allocation12 + $0x18] sm:$0xff]  ;;  %v597_v25 = vld [vmem:[#allocation12 + $0x8] sm:$0xff]  ;;  %s2125_s20 = sld [smem:[#allocation33_spill]] }
  0x4d   : > { %589 = vmatpush.msra.mxu0 %v564_v4  ;;  %619 = vmatpush.msra.mxu1 %v599_v23  ;;  %v598_v24 = vld [vmem:[#allocation12 + $0x10] sm:$0xff]  ;;  %v596_v26 = vld [vmem:[#allocation12] sm:$0xff] }
  0x4e   : > { %657 = vmatpush.msra.mxu2 %v632_v8  ;;  %v1436_v34 = vld [vmem:[%s2085_s7] ss:$0 sm:$0xff]  ;;  %v739_v38 = vld [vmem:[#allocation13] sm:$0xff] }
  0x4f   : > { %590 = vmatpush.msra.mxu0 %v563_v7  ;;  %620 = vmatpush.msra.mxu1 %v598_v24 }
  0x50   : > { %1297 = vmatmul.msk.f32.vlgmr.msra.gmra.mxu0 %vm571_vm0, %v562_v9  ;;  %658 = vmatpush.msra.mxu2 %v631_v10 }
  0x51   : > { %1299 = vmatmul.msk.f32.vlgmr.msra.gmra.mxu2 %vm571_vm0, %v562_v9  ;;  %621 = vmatpush.msra.mxu1 %v597_v25  ;;  %s2123_s13 = smov %s2122_s23  ;;  %s1130_s25 = scalar_lea.hbm %s2122_s23, %s1317_s19 }
  0x52   : > { %s1660_s4 = scalar_lea.hbm %s2123_s13, 16 }
  0x53   : > { %622 = vmatpush.msra.mxu1 %v596_v26 }
  0x54   : > { %1298 = vmatmul.msk.f32.vlgmr.msra.gmra.mxu1 %vm571_vm0, %v1962_v3 }
  0xcd   : > { %v592_v12 = vpop.f32.mrf.mxu0 }
  0xce   : > { %v593_v13 = vadd.f32 %v1434_v11, %v592_v12 }
  0xd0   : > { %595 = vst.msk [vmem:[#allocation2] sm:$0xff] %vm571_vm0, %v593_v13 }
  0xd1   : > { %v624_v35 = vpop.f32.mrf.mxu1 }
  0xd2   : > { %v625_v36 = vadd.f32 %v1436_v34, %v624_v35 }
  0xd4   : > { %v660_v15 = vpop.f32.mrf.mxu2  ;;  %627 = vst.msk [vmem:[#allocation3] sm:$0xff] %vm571_vm0, %v625_v36 }
  0xd5   : > { %v661_v17 = vadd.f32 %v1435_v14, %v660_v15 }
  0xd7   : > { %v663_v16 = vld [vmem:[#allocation2] sm:$0xff] }
  0xd8   : > { %868 = vrot.lane.b32.xlu2 %v663_v16, %s1746_s28  ;;  %742 = vrot.lane.b32.xlu1 %v663_v16, %s1747_s17 }
  0xd9   : > { %1300 = vmatpush.xpose.msk.msra.mxu3 %vm665_vm1, %v663_v16 }
  0xdb   : > { %v1994_v40 = vld [vmem:[#allocation3] sm:$0xff] }
  0xdc   : > { %1301 = vmatmul.msk.f32.vlgmr.msra.gmra.mxu3 %vm665_vm1, %v661_v17 }
  0xdd   : > { %734 = vmatpush.msrb.mxu3 %v1994_v40 }
  0xdf   : > { %861 = vmatpush.msra.mxu3 %v739_v38 }
  0xe0   : > { %971 = vrot.lane.b32.xlu2 %v663_v16, %s1748_s18  ;;  %740 = vrot.lane.b32.xlu1 %v661_v17, %s1747_s17 }
  0xe8   : > { %969 = vrot.lane.b32.xlu1 %v661_v17, %s1748_s18 }
 0x132   : > { %v869_v19 = vpop.permute.xlu2 %868 }
 0x13a   : > { %v972_v37 = vpop.permute.xlu2 %971 }
 0x14a   : > { %v743_v18 = vpop.permute.xlu1 %742 }
 0x14b   : > { %1303 = vmatpush.xpose.msk.msrb.mxu0 %vm665_vm1, %v743_v18 }
 0x14f   : > { %1308 = vmatpush.xpose.msk.msra.mxu0 %vm665_vm1, %v869_v19 }
 0x152   : > { %v741_v20 = vpop.permute.xlu1 %740 }
 0x153   : > { %1304 = vmatmul.msk.f32.vlgmr.msrb.gmra.mxu0 %vm665_vm1, %v741_v20 }
 0x15a   : > { %v970_v61 = vpop.permute.xlu1 %969 }
 0x15f   : > { %v689_v21 = vpop.f32.mrf.mxu3 }
 0x160   : > { %v692_v22 = vsel %vm665_vm1, %v689_v21, -inf }
 0x161   : > { %693 = vmax.xlane.f32.xlu0 %v692_v22 }
 0x1d0   : > { %v765_v27 = vpop.f32.mrf.mxu0 }
 0x1d1   : > { %v768_v28 = vsel %vm665_vm1, %v765_v27, -inf }
 0x1d2   : > { %769 = vmax.xlane.f32.xlu2 %v768_v28 }
 0x1d4   : > { %v694_v29 = vpop.xlane.xlu0 %693 }
 0x1d5   : > { %v695_v30 = vsub.f32 %v689_v21, %v694_v29 }
 0x1d7   : > { %v696_v31 = vmul.f32 1.442695, %v695_v30 }
 0x1d9   : > { %1440 = vpow2.f32 %v696_v31 }
 0x1df   : > { %v1441_v32 = vpop.eup %1440 }
 0x1e0   : > { %v698_v33 = vsel %vm665_vm1, %v1441_v32, 0.0 }
 0x1e1   : > { %699 = vadd.xlane.f32.xlu0 %v698_v33 }
 0x1f5   : > { %866 = vrot.lane.b32.xlu0 %v661_v17, %s1746_s28 }
 0x245   : > { %v770_v39 = vpop.xlane.xlu2 %769 }
 0x246   : > { %v771_v41 = vsub.f32 %v765_v27, %v770_v39  ;;  %v819_v27 = vld [vmem:[#allocation13 + $0x8] sm:$0xff] }
 0x247   : > { %838 = vmatpush.msrb.mxu2 %v819_v27  ;;  %v1439_v27 = vld [vmem:[%s2125_s20] ss:$0 sm:$0xff] }
 0x248   : > { %v772_v42 = vmul.f32 1.442695, %v771_v41 }
 0x24a   : > { %1442 = vpow2.f32 %v772_v42 }
 0x250   : > { %v1443_v43 = vpop.eup %1442 }
 0x251   : > { %v774_v44 = vsel %vm665_vm1, %v1443_v43, 0.0 }
 0x252   : > { %775 = vadd.xlane.f32.xlu2 %v774_v44 }
 0x254   : > { %v700_v45 = vpop.xlane.xlu0 %699 }
 0x255   : > { %1444 = vrcp.f32 %v700_v45  ;;  %v712_v49 = vand.u32 2147483648, %v700_v45  ;;  %v710_v51 = vand.u32 2147483647, %v700_v45  ;;  %vm706_vm3 = vweird.f32 %v700_v45 }
 0x257   : > { %v713_v53 = vor.u32 1.1754944e-38, %v712_v49  ;;  %vm711_vm5 = vcmp.eq.f32.partialorder %v710_v51, 8.507059e+37 }
 0x25b   : > { %v1445_v46 = vpop.eup %1444 }
 0x25c   : > { %v702_v47 = vmul.f32 %v1445_v46, %v700_v45  ;;  %vm707_vm2 = vweird.f32 %v1445_v46 }
 0x25d   : > { %vm708_vm4 = vmor %vm706_vm3, %vm707_vm2 }
 0x25e   : > { %v703_v48 = vsub.f32 1.0, %v702_v47 }
 0x260   : > { %v704_v50 = vmul.f32 %v1445_v46, %v703_v48 }
 0x262   : > { %v705_v52 = vadd.f32 %v1445_v46, %v704_v50 }
 0x264   : > { %v709_v54 = vsel %vm708_vm4, %v1445_v46, %v705_v52 }
 0x265   : > { %v714_v55 = vsel %vm711_vm5, %v713_v53, %v709_v54  ;;  %v1047_v53 = vld [vmem:[#allocation13 + $0x18] sm:$0xff]  ;;  %v944_v54 = vld [vmem:[#allocation13 + $0x10] sm:$0xff] }
 0x266   : > { %v715_v56 = vmul.f32 %v1441_v32, %v714_v55  ;;  %963 = vmatpush.msra.mxu2 %v944_v54 }
 0x267   : > { %v867_v57 = vpop.permute.xlu0 %866 }
 0x268   : > { %1302 = vmatmul.msk.f32.vlgmr.msrb.gmra.mxu3 %vm665_vm1, %v715_v56  ;;  %1309 = vmatmul.msk.f32.vlgmr.msra.gmra.mxu0 %vm665_vm1, %v867_v57 }
 0x269   : > { %1312 = vmatpush.xpose.msk.msrb.mxu3 %vm665_vm1, %v972_v37 }
 0x2c5   : > { %v776_v7 = vpop.xlane.xlu2 %775 }
 0x2c6   : > { %v788_v13 = vand.u32 2147483648, %v776_v7  ;;  %vm782_vm7 = vweird.f32 %v776_v7  ;;  %v786_v14 = vand.u32 2147483647, %v776_v7 }
 0x2c8   : > { %v789_v17 = vor.u32 1.1754944e-38, %v788_v13  ;;  %vm787_vm9 = vcmp.eq.f32.partialorder %v786_v14, 8.507059e+37 }
 0x2e5   : > { %v891_v58 = vpop.f32.mrf.mxu0 }
 0x2e6   : > { %v894_v59 = vsel %vm665_vm1, %v891_v58, -inf }
 0x2e7   : > { %895 = vmax.xlane.f32.xlu1 %v894_v59 }
 0x2eb   : > { %v736_v60 = vpop.f32.mrf.mxu3 }
 0x2ec   : > { %1307 = vmatmul.msk.f32.vlgmr.msra.gmra.mxu3 %vm665_vm1, %v736_v60 }
 0x2f4   : > { %1313 = vmatmul.msk.f32.vlgmr.msrb.gmra.mxu3 %vm665_vm1, %v970_v61  ;;  %v1437_v61 = vld [vmem:[%s2087_s9] ss:$0 sm:$0xff] }
 0x35a   : > { %v896_v62 = vpop.xlane.xlu1 %895 }
 0x35b   : > { %v897_v63 = vsub.f32 %v891_v58, %v896_v62 }
 0x35d   : > { %v898_v0 = vmul.f32 1.442695, %v897_v63 }
 0x35f   : > { %1446 = vpow2.f32 %v898_v0 }
 0x360   : > { %1448 = vrcp.f32 %v776_v7 }
 0x365   : > { %v2004_v1 = vpop.eup %1446 }
 0x366   : > { %v900_v2 = vsel %vm665_vm1, %v2004_v1, 0.0  ;;  %v1449_v8 = vpop.eup %1448 }
 0x367   : > { %901 = vadd.xlane.f32.xlu2 %v900_v2  ;;  %v778_v9 = vmul.f32 %v1449_v8, %v776_v7  ;;  %vm783_vm6 = vweird.f32 %v1449_v8 }
 0x368   : > { %vm784_vm8 = vmor %vm782_vm7, %vm783_vm6 }
 0x369   : > { %v779_v10 = vsub.f32 1.0, %v778_v9 }
 0x36b   : > { %v780_v11 = vmul.f32 %v1449_v8, %v779_v10 }
 0x36d   : > { %v781_v12 = vadd.f32 %v1449_v8, %v780_v11 }
 0x36f   : > { %v2008_v4 = vpop.f32.mrf.mxu3  ;;  %v785_v16 = vsel %vm784_vm8, %v1449_v8, %v781_v12 }
 0x370   : > { %v790_v18 = vsel %vm787_vm9, %v789_v17, %v785_v16 }
 0x371   : > { %v791_v20 = vmul.f32 %v1443_v43, %v790_v18 }
 0x377   : > { %v994_v5 = vpop.f32.mrf.mxu3 }
 0x378   : > { %v997_v6 = vsel %vm665_vm1, %v994_v5, -inf }
 0x379   : > { %998 = vmax.xlane.f32.xlu0 %v997_v6 }
 0x37f   : > { %793 = vrot.lane.b32.xlu2 %v1994_v40, %s1747_s17  ;;  %s1134_s17 = sshll.u32 %s1130_s25, 4  ;;  %s1135_s17 = int_to_ptr.hbm [resolvable:$true] %s1134_s17 }
 0x380   : > { %s1654_s30 = sshra.s32 %s1135_s17, 4  ;;  %s1655_s30 = int_to_ptr.hbm [resolvable:$true] %s1654_s30 }
 0x381   : > { %s1656_s15 = scalar_lea.hbm %s1655_s30, 8  ;;  %p1661_p10 = scmp.lt.s32.totalorder %s1655_s30, %s2123_s13 }
 0x382   : > { %p1657_p1 = scmp.ne.s32.totalorder %s1655_s30, %s1656_s15  ;;  %p1662_p11 = scmp.lt.s32.totalorder %s1660_s4, %s1656_s15 }
 0x384   : > { %p1658_p3 = pnand %p1657_p1, %p1907_p2  ;;  %p1663_p12 = por %p1662_p11, %p1661_p10 }
 0x386   : > { %p1659_p9 = pneg %p1658_p3 }
 0x388   : > { %p1664_p13 = pnand %p1663_p12, %p1659_p9 }
 0x38d   : > { %1021 = vrot.lane.b32.xlu0 %v1994_v40, %s1748_s18  ;;  %s1119_s18 = scalar_lea.sflag [#allocation6], %s1933_s8 }
 0x3da   : > { %v902_v15 = vpop.xlane.xlu2 %901 }
 0x3db   : > { %v914_v42 = vand.u32 2147483648, %v902_v15  ;;  %vm908_vm14 = vweird.f32 %v902_v15  ;;  %v912_v44 = vand.u32 2147483647, %v902_v15 }
 0x3dd   : > { %v915_v49 = vor.u32 1.1754944e-38, %v914_v42  ;;  %vm913_vm3 = vcmp.eq.f32.partialorder %v912_v44, 8.507059e+37 }
 0x3e2   : > { %v794_v19 = vpop.permute.xlu2 %793 }
 0x3e3   : > { %814 = vmatpush.msrb.mxu1 %v794_v19 }
 0x3e4   : > { %1305 = vmatmul.msk.f32.vlgmr.msrb.gmra.mxu1 %vm665_vm1, %v791_v20 }
 0x3ec   : > { %v999_v21 = vpop.xlane.xlu0 %998 }
 0x3ed   : > { %v1000_v22 = vsub.f32 %v994_v5, %v999_v21  ;;  %v1749_v5 = vmov 32.0  }
 0x3ef   : > { %v1001_v23 = vmul.f32 1.442695, %v1000_v22 }
 0x3f1   : > { %1450 = vpow2.f32 %v1001_v23 }
 0x3f2   : > { %1452 = vrcp.f32 %v902_v15 }
 0x3f7   : > { %v1451_v24 = vpop.eup %1450 }
 0x3f8   : > { %v1003_v25 = vsel %vm665_vm1, %v1451_v24, 0.0  ;;  %v1453_v29 = vpop.eup %1452 }
 0x3f9   : > { %1004 = vadd.xlane.f32.xlu1 %v1003_v25  ;;  %v904_v31 = vmul.f32 %v1453_v29, %v902_v15  ;;  %vm909_vm11 = vweird.f32 %v1453_v29 }
 0x3fa   : > { %vm910_vm2 = vmor %vm908_vm14, %vm909_vm11 }
 0x3fb   : > { %v905_v32 = vsub.f32 1.0, %v904_v31 }
 0x3fd   : > { %v906_v35 = vmul.f32 %v1453_v29, %v905_v32 }
 0x3ff   : > { %v1022_v26 = vpop.permute.xlu0 %1021 }
 0x400   : > { %1042 = vmatpush.msrb.mxu0 %v1022_v26 }
 0x412   : > { %918 = vrot.lane.b32.xlu1 %v1994_v40, %s1746_s28  ;;  %v907_v40 = vadd.f32 %v1453_v29, %v906_v35  ;;  %s1132_s28 = sshll.u32 %s555_s24, 4  ;;  %s1133_s28 = int_to_ptr.vmem [resolvable:$true] %s1132_s28 }
 0x414   : > { %v911_v47 = vsel %vm910_vm2, %v1453_v29, %v907_v40 }
 0x415   : > { %v916_v50 = vsel %vm913_vm3, %v915_v49, %v911_v47 }
 0x416   : > { %v917_v52 = vmul.f32 %v2004_v1, %v916_v50 }
 0x461   : > { %v816_v28 = vpop.f32.mrf.mxu1 }
 0x462   : > { %1306 = vmatmul.msk.f32.vlgmr.msrb.gmra.mxu2 %vm665_vm1, %v816_v28 }
 0x46c   : > { %v1005_v30 = vpop.xlane.xlu1 %1004 }
 0x46d   : > { %1454 = vrcp.f32 %v1005_v30  ;;  %v1017_v37 = vand.u32 2147483648, %v1005_v30  ;;  %v1015_v39 = vand.u32 2147483647, %v1005_v30  ;;  %vm1011_vm12 = vweird.f32 %v1005_v30 }
 0x46e   : > { %1456 = vrcp.f32 %v1749_v5 }
 0x46f   : > { %v1018_v43 = vor.u32 1.1754944e-38, %v1017_v37  ;;  %vm1016_vm15 = vcmp.eq.f32.partialorder %v1015_v39, 8.507059e+37 }
 0x473   : > { %v1455_v33 = vpop.eup %1454 }
 0x474   : > { %v1007_v34 = vmul.f32 %v1455_v33, %v1005_v30  ;;  %vm1012_vm10 = vweird.f32 %v1455_v33  ;;  %v1457_v6 = vpop.eup %1456 }
 0x475   : > { %vm1013_vm13 = vmor %vm1011_vm12, %vm1012_vm10  ;;  %v1082_v7 = vmul.f32 32.0, %v1457_v6 }
 0x476   : > { %v1008_v36 = vsub.f32 1.0, %v1007_v34 }
 0x477   : > { %v1083_v8 = vsub.f32 1.0, %v1082_v7 }
 0x478   : > { %v1009_v38 = vmul.f32 %v1455_v33, %v1008_v36 }
 0x47a   : > { %v1010_v41 = vadd.f32 %v1455_v33, %v1009_v38 }
 0x47c   : > { %v1014_v45 = vsel %vm1013_vm13, %v1455_v33, %v1010_v41 }
 0x47d   : > { %v1019_v46 = vsel %vm1016_vm15, %v1018_v43, %v1014_v45 }
 0x47e   : > { %v1020_v48 = vmul.f32 %v1451_v24, %v1019_v46  ;;  %v1438_v24 = vld [vmem:[%s2088_s10] ss:$0 sm:$0xff] }
 0x480   : > { %1314 = vmatmul.msk.f32.vlgmr.msrb.gmra.mxu0 %vm665_vm1, %v1020_v48 }
 0x484   : > { %v919_v51 = vpop.permute.xlu1 %918 }
 0x485   : > { %939 = vmatpush.msra.mxu1 %v919_v51 }
 0x486   : > { %1310 = vmatmul.msk.f32.vlgmr.msra.gmra.mxu1 %vm665_vm1, %v917_v52 }
 0x487   : > { %1066 = vmatpush.msrb.mxu1 %v1047_v53 }
 0x4e5   : > { %v840_v57 = vpop.f32.mrf.mxu2 }
 0x4e6   : > { %v864_v58 = vadd.f32 %v2008_v4, %v840_v57  ;;  %v1084_v4 = vmul.f32 %v1457_v6, %v1083_v8 }
 0x4e8   : > { %v1085_v9 = vadd.f32 %v1457_v6, %v1084_v4 }
 0x4fd   : > { %v1044_v55 = vpop.f32.mrf.mxu0 }
 0x4fe   : > { %1315 = vmatmul.msk.f32.vlgmr.msrb.gmra.mxu1 %vm665_vm1, %v1044_v55 }
 0x503   : > { %v941_v56 = vpop.f32.mrf.mxu1 }
 0x504   : > { %1311 = vmatmul.msk.f32.vlgmr.msra.gmra.mxu2 %vm665_vm1, %v941_v56  ;;  %vm1086_vm1 = vweird.f32 %v1457_v6 }
 0x505   : > { %v1087_v10 = vsel %vm1086_vm1, %v1457_v6, %v1085_v9 }
 0x57b   : > { %v1068_v62 = vpop.f32.mrf.mxu1 }
 0x587   : > { %v965_v59 = vpop.f32.mrf.mxu2 }
 0x588   : > { %v968_v60 = vadd.f32 %v965_v59, %v864_v58 }
 0x58a   : > { %v1071_v63 = vadd.f32 %v1068_v62, %v968_v60 }
 0x58c   : > { %v1076_v0 = vadd.f32 %v1437_v61, %v1071_v63 }
 0x58e   : > { %v1077_v1 = vadd.f32 %v1076_v0, %v1962_v3 }
 0x590   : > { %v1078_v2 = vsel %vm571_vm0, %v1077_v1, 0.0 }
 0x591   : > { %1079 = vadd.xlane.f32.xlu2 %v1078_v2 }
 0x604   : > { %v1080_v11 = vpop.xlane.xlu2 %1079 }
 0x605   : > { %v1088_v12 = vmul.f32 %v1087_v10, %v1080_v11 }
 0x607   : > { %v1089_v13 = vsub.f32 %v1077_v1, %v1088_v12 }
 0x609   : > { %v1090_v14 = vmul.f32 %v1089_v13, %v1089_v13 }
 0x60b   : > { %v1091_v15 = vsel %vm571_vm0, %v1090_v14, 0.0 }
 0x60c   : > { %1092 = vadd.xlane.f32.xlu0 %v1091_v15 }
 0x67f   : > { %v1093_v3 = vpop.xlane.xlu0 %1092 }
 0x680   : > { %v1094_v16 = vmul.f32 %v1093_v3, %v1087_v10 }
 0x682   : > { %v1095_v17 = vadd.f32 1e-05, %v1094_v16 }
 0x684   : > { %1458 = vrsqrt.f32 %v1095_v17  ;;  %vm1102_vm5 = vweird.f32 %v1095_v17 }
 0x68a   : > { %v1459_v18 = vpop.eup %1458 }
 0x68b   : > { %v1097_v19 = vmul.f32 %v1459_v18, %v1095_v17  ;;  %vm1103_vm4 = vweird.f32 %v1459_v18 }
 0x68c   : > { %vm1104_vm6 = vmor %vm1102_vm5, %vm1103_vm4 }
 0x68d   : > { %v1098_v20 = vmul.f32 %v1459_v18, %v1097_v19 }
 0x68f   : > { %v1099_v21 = vmul.f32 0.5, %v1098_v20 }
 0x691   : > { %v1100_v22 = vsub.f32 1.5, %v1099_v21 }
 0x693   : > { %v1101_v23 = vmul.f32 %v1459_v18, %v1100_v22 }
 0x695   : > { %v1105_v25 = vsel %vm1104_vm6, %v1459_v18, %v1101_v23 }
 0x696   : > { %v1106_v26 = vmul.f32 %v1105_v25, %v1089_v13 }
 0x698   : > { %v1111_v28 = vmul.f32 %v1438_v24, %v1106_v26 }
 0x69a   : > { %v1116_v29 = vadd.f32 %v1439_v27, %v1111_v28 }
 0x69c   : > { %1117 = vst.msk [vmem:[%s555_s24] sm:$0xff] %vm571_vm0, %v1116_v29 }
 0x69d   : > { %1667 = shalt.err (!%p1664_p13)
}
 0x69e   : > { %1340 = dma.vmem_to_hbm [thread:$0]  (%p1907_p2), %s1133_s28, 128, %s1135_s17, %s1119_s18  }
 0x69f PF: > { %s2126_s8 = sld [smem:[#allocation22_spill]]  ;;  %p1363_p0 = pnand %p1284_p6, %p1914_p5 }
 0x6a1   : > { %p1364_p4 = pneg %p1363_p0 }
 0x6a5   : > { %s1146_s6 = sand.u32 1, %s2126_s8  }
 0x6a6   : > { %s1147_s21 = scalar_lea.sflag [#allocation6], %s1146_s6 }
 0x6a7   : > { %1713 = dma.done.wait (%p1364_p4), %s1147_s21, 128  }
 0x6a8   : > { %1715 = vsyncadd (%p1364_p4), %s1147_s21, 4294967168  ;;  %s33_s26 = sadd.s32 1, %s1738_s26   ;;  %s2128_s23 = sld [smem:[#allocation23_spill]] }
 0x6a9   : > { %p30_p7 = scmp.ge.s32.totalorder %s33_s26, 4   ;;  %s2129_s25 = sld [smem:[#allocation27_spill]] }
 0x6aa   : > { %s2130_s24 = sld [smem:[#allocation24_spill]]  ;;  %s2132_s21 = smov %s1722_s22 }
 0x6ab   : > { %s2131_s27 = sld [smem:[#allocation25_spill]] }
 0x6ad   :  { %32 = sbr.rel (!%p30_p7) target bundleno = 17 (0x11), region = 146 }
 0x6ae   : > { %s2133_s22 = smov %s2128_s23 }
 0x6af   : > { %s2134_s23 = smov %s2129_s25 }
 0x6b1   : > { %s2135_s25 = smov %s2131_s27 }
 0x6b2   :  { %1153 = vsyncpa [#allocation5], 1 }
 0x6b3   :  { %1155 = vsyncpa [#allocation5 + $0x1], 1 }
 0x6b4   :  { %1156 = vsyncpa [#allocation8], 1 }
 0x6b5   :  { %1158 = vsyncpa [#allocation8 + $0x1], 1 }
 0x6b6   :  { %1159 = vsyncpa [#allocation11], 1 }
 0x6b7   :  { %1160 = vsyncpa [#allocation14], 1 }
 0x6b8   :  { %1161 = vsyncpa [#allocation6], 1 }
 0x6b9   :  { %1163 = vsyncpa [#allocation6 + $0x1], 1 }

</bundles_post_ra>
